<compile_context>
chip_gen: v7x
topology: tpu7x:2x2x1
jax: 0.10.0
libtpu: 0.0.40
codegen_flags: <defaults>
</compile_context>

<pallas_src>
import jax
import jax.numpy as jnp
from jax.experimental import pallas as pl
from jax.experimental.pallas import tpu as pltpu

N_HIDDEN = 10          # fc1 out features == fc2 in features
LANES = 128
MAX_TILE_ROWS = 4096   # 4096*128*4 B = 2 MiB per buffer; 2 arrays x 2 buffers = 8 MiB VMEM
MIN_SPLIT_ROWS = 256   # once there is this much work, prefer >=2 tiles (feeds both v7x TCs)


def mlp_kernel(a_ref, c_ref, g_ref, e_ref, x_ref, o_ref):
    """y = A*x + C + sum_k g_k * |x + e_k|   (algebraic fold of relu-MLP).

    x_ref/o_ref: (tile_rows, 128) lane-dense batch slab in VMEM.
    a_ref/c_ref: (1,) f32 in SMEM; g_ref/e_ref: (10,) f32 in SMEM.
    Pure VPU arithmetic; 10 statically-unrolled (add, abs, mul, add) groups per vreg.
    """
    x = x_ref[...]                               # (tile_rows, 128)
    acc = x * a_ref[0] + c_ref[0]                # linear part + all constants (incl. b2)
    for k in range(N_HIDDEN):                    # static unroll
        acc = acc + g_ref[k] * jnp.abs(x + e_ref[k])
    o_ref[...] = acc                             # unmasked lane-dense store


def _round_up(v, m):
    return ((v + m - 1) // m) * m


def _fold_params(w1, b1, w2, b2):
    """Fold fc2 weights/bias into per-hidden-unit coefficients.

    For w1_k != 0:
      w2_k*relu(w1_k x + b1_k) = (w2_k w1_k/2) x + (w2_k b1_k/2)
                                 + (w2_k|w1_k|/2) |x + b1_k/w1_k|
    For w1_k == 0 the contribution is the constant w2_k*relu(b1_k).
    """
    half_w2 = 0.5 * w2
    nonzero = w1 != 0.0
    safe_w1 = jnp.where(nonzero, w1, 1.0)

    a = jnp.sum(half_w2 * w1)                                        # A
    g = jnp.where(nonzero, half_w2 * jnp.abs(w1), 0.0)               # g_k
    e = jnp.where(nonzero, b1 / safe_w1, 0.0)                        # e_k
    c = jnp.sum(jnp.where(nonzero, half_w2 * b1,
                          w2 * jnp.maximum(b1, 0.0))) + b2[0]        # C (includes b2)
    return a.reshape(1), c.reshape(1), g.astype(jnp.float32), e.astype(jnp.float32)


def mlp_forward(x, w1, b1, w2, b2):
    """Forward pass for x of shape (N, 1) float32, returns (N, 1) float32."""
    n = x.shape[0]
    a, c, g, e = _fold_params(w1, b1, w2, b2)

    # Balanced tiling: pick tile_rows from the tile count (never near-doubles work).
    rows_needed = max(1, pl.cdiv(n, LANES))
    n_tiles = pl.cdiv(rows_needed, MAX_TILE_ROWS)
    if n_tiles == 1 and rows_needed >= 2 * MIN_SPLIT_ROWS:
        n_tiles = 2                               # keep both v7x TensorCores busy
    tile_rows = _round_up(pl.cdiv(rows_needed, n_tiles), 8)
    rows = n_tiles * tile_rows
    padded = rows * LANES

    flat = x.reshape(-1)
    if padded == n:
        x2d = flat.reshape(rows, LANES)           # metadata-only reshape: no HBM copy
    else:
        # TODO(synk): for large N that is not tile-aligned, a bulk (no-pad) call plus a
        # tiny tail epilogue would avoid this full HBM->HBM pad copy; pad minimally here.
        x2d = jnp.pad(flat, (0, padded - n)).reshape(rows, LANES)

    smem_spec = pl.BlockSpec(memory_space=pltpu.MemorySpace.SMEM)

    y2d = pl.pallas_call(
        mlp_kernel,
        out_shape=jax.ShapeDtypeStruct((rows, LANES), jnp.float32),
        grid=(n_tiles,),
        in_specs=[
            smem_spec,                                           # A   (1,)
            smem_spec,                                           # C   (1,)
            smem_spec,                                           # g   (10,)
            smem_spec,                                           # e   (10,)
            pl.BlockSpec((tile_rows, LANES), lambda i: (i, 0)),  # x tiles
        ],
        out_specs=pl.BlockSpec((tile_rows, LANES), lambda i: (i, 0)),
        compiler_params=pltpu.CompilerParams(
            # 8 MiB of double-buffered tiles fits default scoped VMEM on v5e/v6e/v7x,
            # so no vmem_limit_bytes override is needed at MAX_TILE_ROWS=4096.
            dimension_semantics=("parallel",),
        ),
    )(a, c, g, e, x2d)

    if padded == n:
        return y2d.reshape(n, 1)
    return y2d.reshape(-1)[:n].reshape(n, 1)


if __name__ == "__main__":
    key = jax.random.PRNGKey(0)
    k1, k2, k3, k4 = jax.random.split(key, 4)

    # nn.Linear(1, 10): weight (10, 1) ~ N(0, 0.6^2), bias (10,) ~ N(0, 0.01^2)
    w1 = 0.6 * jax.random.normal(k1, (N_HIDDEN,), jnp.float32)   # flattened (10,1)
    b1 = 0.01 * jax.random.normal(k2, (N_HIDDEN,), jnp.float32)
    # nn.Linear(10, 1): weight (1, 10) ~ N(0, 0.6^2), bias (1,) ~ N(0, 0.01^2)
    w2 = 0.6 * jax.random.normal(k3, (N_HIDDEN,), jnp.float32)   # flattened (1,10)
    b2 = 0.01 * jax.random.normal(k4, (1,), jnp.float32)

    # Same data as the PyTorch spec: 100 points in [-pi, pi], shape (100, 1).
    n = 100
    x = jnp.linspace(-jnp.pi, jnp.pi, n, dtype=jnp.float32).reshape(n, 1)

    y = mlp_forward(x, w1, b1, w2, b2)
    jax.block_until_ready(y)

    # Plain-JAX reference with the original matmul formulation.
    h_ref = jnp.maximum(x @ w1[None, :] + b1[None, :], 0.0)     # (n, 10)
    y_ref = h_ref @ w2[:, None] + b2[None, :]                   # (n, 1)

    assert y.shape == (n, 1)
    # atol slightly relaxed vs 1e-5: the algebraic relu fold reorders f32 rounding.
    assert jnp.allclose(y, y_ref, atol=2e-5, rtol=1e-5), "mismatch vs reference"

    print("KERNEL_OK")
</pallas_src>

<mosaic_0001>
module attributes {stable_mosaic.version = 11 : i64} {
  func.func @mlp_kernel(%arg0: i32, %arg1: memref<1xf32, #tpu.memory_space<smem>>, %arg2: memref<1xf32, #tpu.memory_space<smem>>, %arg3: memref<10xf32, #tpu.memory_space<smem>>, %arg4: memref<10xf32, #tpu.memory_space<smem>>, %arg5: memref<8x128xf32, #tpu.memory_space<vmem>>, %arg6: memref<8x128xf32, #tpu.memory_space<vmem>>) attributes {dimension_semantics = [#tpu.dimension_semantics<parallel>], iteration_bounds = array<i64: 1>, scalar_prefetch = 0 : i64, scratch_operands = 0 : i64, tpu.core_type = #tpu.core_type<tc>, window_params = [{transform_indices = @transform_0, window_bounds = array<i64: 1>}, {transform_indices = @transform_1, window_bounds = array<i64: 1>}, {transform_indices = @transform_2, window_bounds = array<i64: 10>}, {transform_indices = @transform_3, window_bounds = array<i64: 10>}, {transform_indices = @transform_4, window_bounds = array<i64: 8, 128>}, {transform_indices = @transform_5, window_bounds = array<i64: 8, 128>}]} {
    %c0 = arith.constant 0 : index
    %c0_0 = arith.constant 0 : index
    %0 = vector.load %arg5[%c0, %c0_0] : memref<8x128xf32, #tpu.memory_space<vmem>>, vector<8x128xf32>
    %c0_1 = arith.constant 0 : index
    %1 = memref.load %arg1[%c0_1] : memref<1xf32, #tpu.memory_space<smem>>
    %2 = vector.broadcast %1 : f32 to vector<8x128xf32>
    %3 = arith.mulf %0, %2 : vector<8x128xf32>
    %c0_2 = arith.constant 0 : index
    %4 = memref.load %arg2[%c0_2] : memref<1xf32, #tpu.memory_space<smem>>
    %5 = vector.broadcast %4 : f32 to vector<8x128xf32>
    %6 = arith.addf %3, %5 : vector<8x128xf32>
    %c0_3 = arith.constant 0 : index
    %7 = memref.load %arg3[%c0_3] : memref<10xf32, #tpu.memory_space<smem>>
    %c0_4 = arith.constant 0 : index
    %8 = memref.load %arg4[%c0_4] : memref<10xf32, #tpu.memory_space<smem>>
    %9 = vector.broadcast %8 : f32 to vector<8x128xf32>
    %10 = arith.addf %0, %9 : vector<8x128xf32>
    %11 = math.absf %10 : vector<8x128xf32>
    %12 = vector.broadcast %7 : f32 to vector<8x128xf32>
    %13 = arith.mulf %12, %11 : vector<8x128xf32>
    %14 = arith.addf %6, %13 : vector<8x128xf32>
    %c1 = arith.constant 1 : index
    %15 = memref.load %arg3[%c1] : memref<10xf32, #tpu.memory_space<smem>>
    %c1_5 = arith.constant 1 : index
    %16 = memref.load %arg4[%c1_5] : memref<10xf32, #tpu.memory_space<smem>>
    %17 = vector.broadcast %16 : f32 to vector<8x128xf32>
    %18 = arith.addf %0, %17 : vector<8x128xf32>
    %19 = math.absf %18 : vector<8x128xf32>
    %20 = vector.broadcast %15 : f32 to vector<8x128xf32>
    %21 = arith.mulf %20, %19 : vector<8x128xf32>
    %22 = arith.addf %14, %21 : vector<8x128xf32>
    %c2 = arith.constant 2 : index
    %23 = memref.load %arg3[%c2] : memref<10xf32, #tpu.memory_space<smem>>
    %c2_6 = arith.constant 2 : index
    %24 = memref.load %arg4[%c2_6] : memref<10xf32, #tpu.memory_space<smem>>
    %25 = vector.broadcast %24 : f32 to vector<8x128xf32>
    %26 = arith.addf %0, %25 : vector<8x128xf32>
    %27 = math.absf %26 : vector<8x128xf32>
    %28 = vector.broadcast %23 : f32 to vector<8x128xf32>
    %29 = arith.mulf %28, %27 : vector<8x128xf32>
    %30 = arith.addf %22, %29 : vector<8x128xf32>
    %c3 = arith.constant 3 : index
    %31 = memref.load %arg3[%c3] : memref<10xf32, #tpu.memory_space<smem>>
    %c3_7 = arith.constant 3 : index
    %32 = memref.load %arg4[%c3_7] : memref<10xf32, #tpu.memory_space<smem>>
    %33 = vector.broadcast %32 : f32 to vector<8x128xf32>
    %34 = arith.addf %0, %33 : vector<8x128xf32>
    %35 = math.absf %34 : vector<8x128xf32>
    %36 = vector.broadcast %31 : f32 to vector<8x128xf32>
    %37 = arith.mulf %36, %35 : vector<8x128xf32>
    %38 = arith.addf %30, %37 : vector<8x128xf32>
    %c4 = arith.constant 4 : index
    %39 = memref.load %arg3[%c4] : memref<10xf32, #tpu.memory_space<smem>>
    %c4_8 = arith.constant 4 : index
    %40 = memref.load %arg4[%c4_8] : memref<10xf32, #tpu.memory_space<smem>>
    %41 = vector.broadcast %40 : f32 to vector<8x128xf32>
    %42 = arith.addf %0, %41 : vector<8x128xf32>
    %43 = math.absf %42 : vector<8x128xf32>
    %44 = vector.broadcast %39 : f32 to vector<8x128xf32>
    %45 = arith.mulf %44, %43 : vector<8x128xf32>
    %46 = arith.addf %38, %45 : vector<8x128xf32>
    %c5 = arith.constant 5 : index
    %47 = memref.load %arg3[%c5] : memref<10xf32, #tpu.memory_space<smem>>
    %c5_9 = arith.constant 5 : index
    %48 = memref.load %arg4[%c5_9] : memref<10xf32, #tpu.memory_space<smem>>
    %49 = vector.broadcast %48 : f32 to vector<8x128xf32>
    %50 = arith.addf %0, %49 : vector<8x128xf32>
    %51 = math.absf %50 : vector<8x128xf32>
    %52 = vector.broadcast %47 : f32 to vector<8x128xf32>
    %53 = arith.mulf %52, %51 : vector<8x128xf32>
    %54 = arith.addf %46, %53 : vector<8x128xf32>
    %c6 = arith.constant 6 : index
    %55 = memref.load %arg3[%c6] : memref<10xf32, #tpu.memory_space<smem>>
    %c6_10 = arith.constant 6 : index
    %56 = memref.load %arg4[%c6_10] : memref<10xf32, #tpu.memory_space<smem>>
    %57 = vector.broadcast %56 : f32 to vector<8x128xf32>
    %58 = arith.addf %0, %57 : vector<8x128xf32>
    %59 = math.absf %58 : vector<8x128xf32>
    %60 = vector.broadcast %55 : f32 to vector<8x128xf32>
    %61 = arith.mulf %60, %59 : vector<8x128xf32>
    %62 = arith.addf %54, %61 : vector<8x128xf32>
    %c7 = arith.constant 7 : index
    %63 = memref.load %arg3[%c7] : memref<10xf32, #tpu.memory_space<smem>>
    %c7_11 = arith.constant 7 : index
    %64 = memref.load %arg4[%c7_11] : memref<10xf32, #tpu.memory_space<smem>>
    %65 = vector.broadcast %64 : f32 to vector<8x128xf32>
    %66 = arith.addf %0, %65 : vector<8x128xf32>
    %67 = math.absf %66 : vector<8x128xf32>
    %68 = vector.broadcast %63 : f32 to vector<8x128xf32>
    %69 = arith.mulf %68, %67 : vector<8x128xf32>
    %70 = arith.addf %62, %69 : vector<8x128xf32>
    %c8 = arith.constant 8 : index
    %71 = memref.load %arg3[%c8] : memref<10xf32, #tpu.memory_space<smem>>
    %c8_12 = arith.constant 8 : index
    %72 = memref.load %arg4[%c8_12] : memref<10xf32, #tpu.memory_space<smem>>
    %73 = vector.broadcast %72 : f32 to vector<8x128xf32>
    %74 = arith.addf %0, %73 : vector<8x128xf32>
    %75 = math.absf %74 : vector<8x128xf32>
    %76 = vector.broadcast %71 : f32 to vector<8x128xf32>
    %77 = arith.mulf %76, %75 : vector<8x128xf32>
    %78 = arith.addf %70, %77 : vector<8x128xf32>
    %c9 = arith.constant 9 : index
    %79 = memref.load %arg3[%c9] : memref<10xf32, #tpu.memory_space<smem>>
    %c9_13 = arith.constant 9 : index
    %80 = memref.load %arg4[%c9_13] : memref<10xf32, #tpu.memory_space<smem>>
    %81 = vector.broadcast %80 : f32 to vector<8x128xf32>
    %82 = arith.addf %0, %81 : vector<8x128xf32>
    %83 = math.absf %82 : vector<8x128xf32>
    %84 = vector.broadcast %79 : f32 to vector<8x128xf32>
    %85 = arith.mulf %84, %83 : vector<8x128xf32>
    %86 = arith.addf %78, %85 : vector<8x128xf32>
    %c0_14 = arith.constant 0 : index
    %c0_15 = arith.constant 0 : index
    %87 = vector.load %arg6[%c0_14, %c0_15] : memref<8x128xf32, #tpu.memory_space<vmem>>, vector<8x128xf32>
    tpu.vector_store %arg6[%c0_14, %c0_15], %86 {strides = array<i32>} : memref<8x128xf32, #tpu.memory_space<vmem>>, vector<8x128xf32>,
    return
  }
  func.func @transform_0(%arg0: i32) -> i32 {
    %c0_i32 = arith.constant 0 : i32
    %c0_i32_0 = arith.constant 0 : i32
    return %c0_i32 : i32
  }
  func.func @transform_1(%arg0: i32) -> i32 {
    %c0_i32 = arith.constant 0 : i32
    %c0_i32_0 = arith.constant 0 : i32
    return %c0_i32 : i32
  }
  func.func @transform_2(%arg0: i32) -> i32 {
    %c0_i32 = arith.constant 0 : i32
    %c0_i32_0 = arith.constant 0 : i32
    return %c0_i32 : i32
  }
  func.func @transform_3(%arg0: i32) -> i32 {
    %c0_i32 = arith.constant 0 : i32
    %c0_i32_0 = arith.constant 0 : i32
    return %c0_i32 : i32
  }
  func.func @transform_4(%arg0: i32) -> (i32, i32) {
    %c0_i32 = arith.constant 0 : i32
    %c0_i32_0 = arith.constant 0 : i32
    return %arg0, %c0_i32 : i32, i32
  }
  func.func @transform_5(%arg0: i32) -> (i32, i32) {
    %c0_i32 = arith.constant 0 : i32
    %c0_i32_0 = arith.constant 0 : i32
    return %arg0, %c0_i32 : i32, i32
  }
}

</mosaic_0001>

<bundles_post_ra>
// kernel: tpu_custom_call.1
= control target key start
LH: loop header
LB: loop body
LE: loop exit
PB: predicated region body
PF: predicated region fallthrough
CT: control target
= control target key end

     0   :  { %12 = vsyncpa [#allocation6], 0  ;;  %s337_s0 = inlined_call_operand.<no memory space> [shape: f32[1], index: 0, kind: input, shape index: {}]   ;;  %s338_s1 = inlined_call_operand.<no memory space> [shape: f32[1], index: 1, kind: input, shape index: {}]   ;;  %s339_s2 = inlined_call_operand.vmem [shape: f32[10], index: 2, kind: input, shape index: {}]   ;;  %s340_s3 = inlined_call_operand.vmem [shape: f32[10], index: 3, kind: input, shape index: {}]   ;;  %s341_s4 = inlined_call_operand.vmem [shape: f32[8,128], index: 4, kind: input, shape index: {}]   ;;  %s342_s5 = inlined_call_operand.hbm [shape: f32[8,128], index: 5, kind: output, shape index: {}]  }
   0x1   :  { %13 = vsyncpa [#allocation8], 0 }
   0x2   :  { %14 = vsyncpa [#allocation5], 0  ;;  %s25_s20 = sshll.u32 %s339_s2, 4  ;;  %s35_s23 = sshll.u32 %s340_s3, 4  ;;  %s26_s20 = int_to_ptr.vmem [resolvable:$true] %s25_s20  ;;  %s36_s23 = int_to_ptr.vmem [resolvable:$true] %s35_s23 }
   0x3   :  { %s173_s24 = scalar_lea.vmem %s26_s20, 16  ;;  %p178_p1 = scmp.lt.s32.totalorder %s26_s20, %s26_s20 }
   0x4   :  { %p174_p0 = scmp.ne.s32.totalorder %s26_s20, %s173_s24  ;;  %p179_p2 = scmp.lt.s32.totalorder %s173_s24, %s173_s24 }
   0x6   :  { %p180_p3 = por %p179_p2, %p178_p1 }
   0x8   :  { %p181_p4 = pnand %p180_p3, %p174_p0 }
   0xa   :  { %184 = shalt.err (!%p181_p4)
}
   0xb   :  { %s225_s25 = smov [#allocation4]   ;;  %s185_s26 = scalar_lea.vmem %s36_s23, 16 }
   0xc   :  { %28 = dma.vmem_to_smem %s26_s20, 16, %s225_s25, [#allocation6]  }
   0xd   :  { %p186_p5 = scmp.ne.s32.totalorder %s36_s23, %s185_s26  ;;  %p190_p6 = scmp.lt.s32.totalorder %s36_s23, %s36_s23 }
   0xe   :  { %p191_p7 = scmp.lt.s32.totalorder %s185_s26, %s185_s26 }
  0x10   :  { %p192_p8 = por %p191_p7, %p190_p6 }
  0x12   :  { %p193_p9 = pnand %p192_p8, %p186_p5 }
  0x14   :  { %196 = shalt.err (!%p193_p9)
}
  0x15   :  { %s226_s2 = smov [#allocation7]  }
  0x16   :  { %38 = dma.vmem_to_smem %s36_s23, 16, %s226_s2, [#allocation8]  }
  0x17   :  { %219 = dma.done.wait [#allocation6], 16  }
  0x18   :  { %220 = vsyncadd [#allocation6], 4294967280 }
  0x19   :  { %221 = dma.done.wait [#allocation8], 16  }
  0x1a   :  { %222 = vsyncadd [#allocation8], 4294967280 }
  0x1b   :  { %47 = sfence }
  0x1c   :  { %v50_v0 = vstv %s337_s0  ;;  %s267_s28 = sld [smem:[#allocation4]]  ;;  %s269_s30 = sld [smem:[#allocation4 + $0x1]]  ;;  %v274_v1 = vld [vmem:[%s341_s4] sm:$0xff]  ;;  %v53_v3 = vstv %s338_s1 }
  0x1d   :  { %s56_s29 = sld [smem:[#allocation7]]  ;;  %s153_s6 = sld [smem:[#allocation7 + $0x1]]  ;;  %v51_v2 = vmul.f32 %v50_v0, %v274_v1 }
  0x1e   :  { %s276_s9 = sld [smem:[#allocation4 + $0x2]]  ;;  %s279_s11 = sld [smem:[#allocation4 + $0x3]] }
  0x1f   :  { %s155_s10 = sld [smem:[#allocation7 + $0x2]]  ;;  %s157_s0 = sld [smem:[#allocation7 + $0x3]]  ;;  %v54_v5 = vadd.f32 %v53_v3, %v51_v2 }
  0x20   :  { %s284_s14 = sld [smem:[#allocation4 + $0x4]]  ;;  %s286_s4 = sld [smem:[#allocation7 + $0x5]] }
  0x21   :  { %s159_s15 = sld [smem:[#allocation7 + $0x4]]  ;;  %s288_s16 = sld [smem:[#allocation7 + $0x6]] }
  0x22   :  { %s291_s17 = sld [smem:[#allocation7 + $0x7]]  ;;  %v60_v8 = vstv %s267_s28  ;;  %v68_v10 = vstv %s269_s30  ;;  %s296_s1 = sld [smem:[#allocation4 + $0x5]] }
  0x23   :  { %v57_v4 = vstv %s56_s29  ;;  %v65_v7 = vstv %s153_s6  ;;  %s298_s18 = sld [smem:[#allocation7 + $0x8]]  ;;  %s302_s19 = sld [smem:[#allocation7 + $0x9]] }
  0x24   :  { %v58_v6 = vadd.f32 %v57_v4, %v274_v1  ;;  %v66_v9 = vadd.f32 %v65_v7, %v274_v1  ;;  %v76_v14 = vstv %s276_s9  ;;  %v84_v18 = vstv %s279_s11  ;;  %s306_s20 = sld [smem:[#allocation4 + $0x6]]  ;;  %s312_s21 = sld [smem:[#allocation4 + $0x7]] }
  0x25   :  { %v73_v11 = vstv %s155_s10  ;;  %v81_v15 = vstv %s157_s0  ;;  %s166_s22 = sld [smem:[#allocation4 + $0x8]]  ;;  %s168_s23 = sld [smem:[#allocation4 + $0x9]] }
  0x26   :  { %v59_v12 = vand.u32 2147483647, %v58_v6  ;;  %v74_v13 = vadd.f32 %v73_v11, %v274_v1  ;;  %v67_v16 = vand.u32 2147483647, %v66_v9  ;;  %v82_v17 = vadd.f32 %v81_v15, %v274_v1  ;;  %s227_s24 = smov [#allocation9]  }
  0x27   :  { %v89_v19 = vstv %s159_s15  ;;  %v97_v23 = vstv %s286_s4  ;;  %v92_v26 = vstv %s284_s14  ;;  %v105_v31 = vstv %s288_s16  ;;  %s142_s25 = sshll.u32 %s227_s24, 4  ;;  %s143_s25 = int_to_ptr.vmem [resolvable:$true] %s142_s25 }
  0x28   :  { %v61_v20 = vmul.f32 %v60_v8, %v59_v12  ;;  %v75_v21 = vand.u32 2147483647, %v74_v13  ;;  %v90_v22 = vadd.f32 %v89_v19, %v274_v1  ;;  %v69_v24 = vmul.f32 %v68_v10, %v67_v16  ;;  %s197_s26 = scalar_lea.vmem %s143_s25, 128  ;;  %p202_p11 = scmp.lt.s32.totalorder %s143_s25, %s143_s25 }
  0x29   :  { %v83_v25 = vand.u32 2147483647, %v82_v17  ;;  %v98_v27 = vadd.f32 %v97_v23, %v274_v1  ;;  %v106_v32 = vadd.f32 %v105_v31, %v274_v1  ;;  %v113_v36 = vstv %s291_s17  ;;  %p198_p10 = scmp.ne.s32.totalorder %s143_s25, %s197_s26  ;;  %p203_p12 = scmp.lt.s32.totalorder %s197_s26, %s197_s26 }
  0x2a   :  { %v62_v28 = vadd.f32 %v61_v20, %v54_v5  ;;  %v77_v29 = vmul.f32 %v76_v14, %v75_v21  ;;  %v91_v30 = vand.u32 2147483647, %v90_v22  ;;  %v100_v38 = vstv %s296_s1 }
  0x2b   :  { %v85_v34 = vmul.f32 %v84_v18, %v83_v25  ;;  %v99_v35 = vand.u32 2147483647, %v98_v27  ;;  %v114_v39 = vadd.f32 %v113_v36, %v274_v1  ;;  %v121_v40 = vstv %s298_s18  ;;  %p204_p13 = por %p203_p12, %p202_p11 }
  0x2c   :  { %v70_v33 = vadd.f32 %v69_v24, %v62_v28  ;;  %v93_v37 = vmul.f32 %v92_v26, %v91_v30  ;;  %v107_v42 = vand.u32 2147483647, %v106_v32  ;;  %v122_v43 = vadd.f32 %v121_v40, %v274_v1 }
  0x2d   :  { %v129_v44 = vstv %s302_s19  ;;  %v108_v45 = vstv %s306_s20  ;;  %v101_v47 = vmul.f32 %v100_v38, %v99_v35  ;;  %v115_v48 = vand.u32 2147483647, %v114_v39  ;;  %p205_p0 = pnand %p204_p13, %p198_p10 }
  0x2e   :  { %v78_v41 = vadd.f32 %v77_v29, %v70_v33  ;;  %v130_v49 = vadd.f32 %v129_v44, %v274_v1  ;;  %v116_v50 = vstv %s312_s21  ;;  %v109_v52 = vmul.f32 %v108_v45, %v107_v42 }
  0x2f   :  { %v123_v53 = vand.u32 2147483647, %v122_v43  ;;  %v124_v54 = vstv %s166_s22  ;;  %v117_v56 = vmul.f32 %v116_v50, %v115_v48  ;;  %v132_v58 = vstv %s168_s23 }
  0x30   :  { %v86_v46 = vadd.f32 %v85_v34, %v78_v41  ;;  %v131_v57 = vand.u32 2147483647, %v130_v49 }
  0x31   :  { %v125_v60 = vmul.f32 %v124_v54, %v123_v53 }
  0x32   :  { %v94_v51 = vadd.f32 %v93_v37, %v86_v46  ;;  %v133_v62 = vmul.f32 %v132_v58, %v131_v57 }
  0x34   :  { %v102_v55 = vadd.f32 %v101_v47, %v94_v51 }
  0x36   :  { %v110_v59 = vadd.f32 %v109_v52, %v102_v55 }
  0x38   :  { %v118_v61 = vadd.f32 %v117_v56, %v110_v59 }
  0x3a   :  { %v126_v63 = vadd.f32 %v125_v60, %v118_v61 }
  0x3c   :  { %v134_v0 = vadd.f32 %v133_v62, %v126_v63 }
  0x3e   :  { %135 = vst [vmem:[#allocation9] sm:$0xff] %v134_v0 }
  0x3f   :  { %208 = shalt.err (!%p205_p0)
}
  0x40   :  { %s209_s27 = scalar_lea.hbm %s342_s5, 128 }
  0x41   :  { %p210_p1 = scmp.ne.s32.totalorder %s342_s5, %s209_s27  ;;  %p213_p2 = scmp.lt.u32.totalorder %s209_s27, %s342_s5 }
  0x43   :  { %p215_p3 = pnand %p213_p2, %p210_p1 }
  0x45   :  { %218 = shalt.err (!%p215_p3)
}
  0x46   :  { %145 = dma.vmem_to_hbm [thread:$0]  %s143_s25, 128, %s342_s5, [#allocation5]  }
  0x47   :  { %223 = dma.done.wait [#allocation5], 128  }
  0x48   :  { %224 = vsyncadd [#allocation5], 4294967168 }
  0x49   :  { %149 = vsyncpa [#allocation5], 1 }
  0x4a   :  { %150 = vsyncpa [#allocation6], 1 }
  0x4b   :  { %151 = vsyncpa [#allocation8], 1 }

</bundles_post_ra>
